<compile_context>
chip_gen: v6e
topology: v6e:2x2x1
jax: 0.10.0
libtpu: 0.0.40
codegen_flags: <defaults>
</compile_context>

<pallas_src>
import numpy as np
import jax
import jax.numpy as jnp
from jax import lax
from jax.experimental import pallas as pl
from jax.experimental.pallas import tpu as pltpu


# ----------------------------------------------------------------------------
# small helpers
# ----------------------------------------------------------------------------
def make_coordinate_grid(h, w):
    x = 2.0 * (jnp.arange(w, dtype=jnp.float32) / (w - 1)) - 1.0
    y = 2.0 * (jnp.arange(h, dtype=jnp.float32) / (h - 1)) - 1.0
    xx = jnp.tile(x[None, :], (h, 1))
    yy = jnp.tile(y[:, None], (1, w))
    return jnp.stack([xx, yy], axis=2)            # (h, w, 2), last dim = (x, y)


def _largest_divisor(n, cap):
    for d in range(min(n, cap), 0, -1):
        if n % d == 0:
            return d
    return 1


def _pick_lane_tile(n, cap=2048):
    """Largest multiple-of-128 divisor of n that is <= cap (or n itself)."""
    if n <= cap or n % 128 != 0:
        return n
    t = cap - (cap % 128)
    while t >= 128:
        if n % t == 0:
            return t
        t -= 128
    return n


# ----------------------------------------------------------------------------
# L1-mean: tiled, pipelined Pallas reduction for large tensors
# ----------------------------------------------------------------------------
_L1_PALLAS_MIN_ELEMS = 1024    # kept low so the toy demo exercises the kernel
_L1_BLOCK_ROWS = 1024          # (1024, 128) f32 block ~ 512 KiB per buffer


def _make_l1_kernel(total_rows, block_rows):
    ragged = (total_rows % block_rows) != 0

    def kernel(x_ref, y_ref, o_ref):
        pid = pl.program_id(0)

        @pl.when(pid == 0)
        def _init():
            o_ref[...] = jnp.zeros_like(o_ref)

        d = jnp.abs(x_ref[...].astype(jnp.float32)
                    - y_ref[...].astype(jnp.float32))
        if ragged:
            row = pid * block_rows + lax.broadcasted_iota(jnp.int32, d.shape, 0)
            d = jnp.where(row < total_rows, d, 0.0)
        o_ref[...] = o_ref[...] + jnp.sum(d)

    return kernel


def l1_mean(x, y):
    """mean(|x - y|).  Large 128-aligned tensors -> tiled Pallas reduction
    (native dtype in, cast in-kernel); tiny / ragged tensors -> plain JAX."""
    n = int(np.prod(x.shape))
    if n < _L1_PALLAS_MIN_ELEMS or (n % 128) != 0:
        return jnp.mean(jnp.abs(x.astype(jnp.float32) - y.astype(jnp.float32)))
    rows = n // 128
    block_rows = rows if rows <= _L1_BLOCK_ROWS else _L1_BLOCK_ROWS
    xr = x.reshape(rows, 128)
    yr = y.reshape(rows, 128)
    s = pl.pallas_call(
        _make_l1_kernel(rows, block_rows),
        out_shape=jax.ShapeDtypeStruct((1, 1), jnp.float32),
        grid=(pl.cdiv(rows, block_rows),),
        in_specs=[pl.BlockSpec((block_rows, 128), lambda i: (i, 0)),
                  pl.BlockSpec((block_rows, 128), lambda i: (i, 0))],
        out_specs=pl.BlockSpec((1, 1), lambda i: (0, 0)),
        compiler_params=pltpu.CompilerParams(
            dimension_semantics=("arbitrary",)),
    )(xr, yr)
    return s[0, 0] / n


# ----------------------------------------------------------------------------
# AntiAliasInterpolation2d : zero-pad + depthwise Gaussian blur + ::s subsample
# expressed as out = A @ x @ B (separable taps, pad and stride folded into the
# constant matrices) — MXU per grid step over several channel maps.
# ----------------------------------------------------------------------------
def _make_blur_kernel(cb):
    def kernel(x_ref, a_ref, b_ref, o_ref):
        a = a_ref[...]                                                # (Ho, H)
        bm = b_ref[...]                                               # (W, Wo)
        for m in range(cb):
            xm = x_ref[m].astype(jnp.float32)                         # (H, W)
            t = jnp.dot(xm, bm, preferred_element_type=jnp.float32)   # (H, Wo)
            o_ref[m] = jnp.dot(a, t, preferred_element_type=jnp.float32)
    return kernel


def anti_alias_interpolate(x, scale):
    """Matches AntiAliasInterpolation2d.forward."""
    if float(scale) == 1.0:
        return x
    B, C, H, W = x.shape
    s = int(1.0 / scale)
    sigma = (1.0 / scale - 1.0) / 2.0
    ksize = 2 * round(sigma * 4) + 1
    ka = ksize // 2
    ax = np.arange(ksize, dtype=np.float64)
    mean = (ksize - 1) / 2.0
    k1 = np.exp(-((ax - mean) ** 2) / (2.0 * sigma ** 2))
    k1 = (k1 / k1.sum()).astype(np.float32)        # normalized separable taps

    Ho = (H + s - 1) // s
    Wo = (W + s - 1) // s
    A = np.zeros((Ho, H), np.float32)              # row mix (+ zero-pad + stride)
    for io in range(Ho):
        for di in range(ksize):
            r = io * s + di - ka
            if 0 <= r < H:
                A[io, r] += k1[di]
    Bm = np.zeros((W, Wo), np.float32)             # col mix (+ zero-pad + stride)
    for jo in range(Wo):
        for dj in range(ksize):
            c = jo * s + dj - ka
            if 0 <= c < W:
                Bm[c, jo] += k1[dj]

    bc = B * C
    cb = _largest_divisor(bc, 8)                   # several maps per grid step
    xr = x.reshape(bc, H, W)
    out = pl.pallas_call(
        _make_blur_kernel(cb),
        out_shape=jax.ShapeDtypeStruct((bc, Ho, Wo), jnp.float32),
        grid=(bc // cb,),
        in_specs=[pl.BlockSpec((cb, H, W), lambda i: (i, 0, 0)),
                  pl.BlockSpec((Ho, H), lambda i: (0, 0)),
                  pl.BlockSpec((W, Wo), lambda i: (0, 0))],
        out_specs=pl.BlockSpec((cb, Ho, Wo), lambda i: (i, 0, 0)),
        compiler_params=pltpu.CompilerParams(
            dimension_semantics=("parallel",)),
    )(xr, jnp.asarray(A), jnp.asarray(Bm))
    return out.reshape(B, C, Ho, Wo)


# ----------------------------------------------------------------------------
# Fused TPS (mode='random') frame warp + bilinear grid_sample
# (padding_mode='reflection', align_corners=True)
# ----------------------------------------------------------------------------
def _make_tps_sample_kernel(H, W, C, TN):
    def reflect(v, size):
        if size <= 1:                              # guard span == 0
            return jnp.zeros_like(v)
        span = float(size - 1)
        v = jnp.abs(v)
        extra = jnp.mod(v, span)
        flips = jnp.floor(v / span)
        out = jnp.where(jnp.mod(flips, 2.0) == 0.0, extra, span - extra)
        return jnp.clip(out, 0.0, span)

    def kernel(grid_ref, theta_ref, cp_ref, img_ref, o_ref):
        # ---- TPS warp of the base coordinate tile -------------------------
        x = grid_ref[0:1, :]                       # (1, TN)
        y = grid_ref[1:2, :]
        cpx = cp_ref[0, :, 0:1]                    # (K, 1)
        cpy = cp_ref[0, :, 1:2]
        cpar = cp_ref[0, :, 2:3]
        dx = x - cpx                               # (K, TN)
        dy = y - cpy
        r2 = dx * dx + dy * dy
        u = r2 * jnp.log(r2 + 1e-6)
        res = jnp.sum(cpar * u, axis=0, keepdims=True)          # (1, TN)
        a00 = theta_ref[0, 0]; a01 = theta_ref[0, 1]; tx = theta_ref[0, 2]
        a10 = theta_ref[0, 3]; a11 = theta_ref[0, 4]; ty = theta_ref[0, 5]
        gx = a00 * x + a01 * y + tx + res
        gy = a10 * x + a11 * y + ty + res

        # ---- bilinear sample (reflection padding, align_corners=True) ----
        ix = reflect((gx + 1.0) * 0.5 * (W - 1), W)
        iy = reflect((gy + 1.0) * 0.5 * (H - 1), H)
        ix0f = jnp.floor(ix)
        iy0f = jnp.floor(iy)
        wx1 = ix - ix0f
        wx0 = 1.0 - wx1
        wy1 = iy - iy0f
        wy0 = 1.0 - wy1
        ix0 = jnp.clip(ix0f, 0.0, W - 1.0).astype(jnp.int32)
        ix1 = jnp.clip(ix0f + 1.0, 0.0, W - 1.0).astype(jnp.int32)
        iy0 = jnp.clip(iy0f, 0.0, H - 1.0).astype(jnp.int32)
        iy1 = jnp.clip(iy0f + 1.0, 0.0, H - 1.0).astype(jnp.int32)

        wcol = lax.broadcasted_iota(jnp.int32, (W, TN), 0)
        hrow = lax.broadcasted_iota(jnp.int32, (H, TN), 0)
        # column-mix matrix (W, TN): 2 non-zeros per point, bf16 for the MXU
        wxm = (jnp.where(wcol == ix0, wx0, 0.0)
               + jnp.where(wcol == ix1, wx1, 0.0)).astype(jnp.bfloat16)
        # row-mix weights (H, TN): applied on the VPU, f32
        wym = (jnp.where(hrow == iy0, wy0, 0.0)
               + jnp.where(hrow == iy1, wy1, 0.0))

        for c in range(C):
            imc = img_ref[0, c].astype(jnp.bfloat16)                     # (H, W)
            colmix = jnp.dot(imc, wxm,
                             preferred_element_type=jnp.float32)         # (H, TN)
            o_ref[0, c:c + 1, :] = jnp.sum(wym * colmix, axis=0,
                                           keepdims=True)                # (1, TN)

    return kernel


def tps_grid_sample(img, theta, control_points, control_params):
    """Fused TPS.transform_frame + F.grid_sample(..., padding_mode='reflection',
    align_corners=True).  Grid = (batch, pixel-tile); image block stays resident
    across the tile axis; output is lane-dense (B, C, N)."""
    B, C, H, W = img.shape
    N = H * W
    K = control_points.shape[0]
    base = jnp.transpose(make_coordinate_grid(H, W).reshape(N, 2), (1, 0))
    base = base.astype(jnp.float32)                                  # (2, N)
    theta_f = theta.astype(jnp.float32).reshape(B, 6)
    cp = jnp.concatenate(
        [jnp.broadcast_to(control_points.astype(jnp.float32)[None], (B, K, 2)),
         control_params.astype(jnp.float32)[:, :, None]], axis=-1)   # (B, K, 3)

    TN = _pick_lane_tile(N)
    out = pl.pallas_call(
        _make_tps_sample_kernel(H, W, C, TN),
        out_shape=jax.ShapeDtypeStruct((B, C, N), jnp.float32),
        grid=(B, N // TN),
        in_specs=[
            pl.BlockSpec((2, TN), lambda b, j: (0, j)),
            pl.BlockSpec((1, 6), lambda b, j: (b, 0),
                         memory_space=pltpu.MemorySpace.SMEM),
            pl.BlockSpec((1, K, 3), lambda b, j: (b, 0, 0)),
            pl.BlockSpec((1, C, H, W), lambda b, j: (b, 0, 0, 0)),
        ],
        out_specs=pl.BlockSpec((1, C, TN), lambda b, j: (b, 0, j)),
        compiler_params=pltpu.CompilerParams(
            dimension_semantics=("parallel", "parallel")),
    )(base, theta_f, cp, img)
    return out.reshape(B, C, H, W)


# ----------------------------------------------------------------------------
# Tiny-operand math kept in plain JAX (pallas_call overhead would dominate)
# ----------------------------------------------------------------------------
def tps_warp_points(coords, theta, control_points, control_params):
    """TPS.warp_coordinates (mode='random') on keypoint-sized inputs."""
    coords = coords.astype(jnp.float32)
    affine = (jnp.einsum('bij,bnj->bni', theta[:, :, :2], coords)
              + theta[:, :, 2][:, None, :])
    d = coords[:, :, None, :] - control_points[None, None, :, :]
    r2 = jnp.sum(d * d, axis=-1)
    u = r2 * jnp.log(r2 + 1e-6)
    res = jnp.sum(u * control_params[:, None, :], axis=-1, keepdims=True)
    return affine + res


def bg_equivariance_loss(bg_param, bg_param_reverse):
    prod = jnp.matmul(bg_param.astype(jnp.float32),
                      bg_param_reverse.astype(jnp.float32))
    eye = jnp.eye(3, dtype=jnp.float32)[None]
    return jnp.mean(jnp.abs(eye - prod))


def _kp_distance(kp, num_kp):
    d = kp[:, :, None, :] - kp[:, None, :, :]
    dist = jnp.sqrt((d * d).sum(-1) + 1e-8)
    val = dist + jnp.eye(num_kp, dtype=kp.dtype) * 0.2 - 0.2
    return (-jnp.sign(val) + 1.0).mean()


# ----------------------------------------------------------------------------
# EquivarianceLoss forward
# ----------------------------------------------------------------------------
def equivariance_forward(driving, kp_driving, kp_extractor, transform_params, rng):
    out = {}
    B = driving.shape[0]
    k_aff, k_tps = jax.random.split(rng)
    pts = int(transform_params['points_tps'])
    theta = (transform_params['sigma_affine']
             * jax.random.normal(k_aff, (B, 2, 3), jnp.float32)
             + jnp.eye(2, 3, dtype=jnp.float32)[None])
    control_points = make_coordinate_grid(pts, pts).reshape(pts * pts, 2)
    control_params = (transform_params['sigma_tps']
                      * jax.random.normal(k_tps, (B, pts * pts), jnp.float32))

    transformed_frame = tps_grid_sample(driving, theta, control_points,
                                        control_params)
    transformed_kp = kp_extractor(transformed_frame)
    out['transformed_frame'] = transformed_frame
    out['transformed_kp'] = transformed_kp

    # keypoint-sized TPS warp + L1 (~B*num_kp*2 elements) -> plain JAX
    warped = tps_warp_points(transformed_kp['fg_kp'], theta, control_points,
                             control_params)
    b, n, d = warped.shape
    kp_d = kp_driving['fg_kp'].reshape(b, -1, n, d)[:, 0, :, :]
    out['loss'] = jnp.mean(jnp.abs(kp_d - warped))
    return out


# ----------------------------------------------------------------------------
# ETPSLoss
# ----------------------------------------------------------------------------
class ETPSLossPallas:
    def __init__(self, channels, scales, loss_weights, use_vit_loss=False):
        self.channels = channels
        self.scales = scales
        self.loss_weights = loss_weights
        self.extractor = None
        # TODO(synk): lpips.LPIPS(net='vgg') (pretrained VGG16 perceptual metric)
        # and the optional DINO-ViT structure loss have no self-contained Pallas
        # equivalent.
        if use_vit_loss:
            raise NotImplementedError("use_vit_loss (DINO ViT) not supported")

    def pyramid(self, x):
        return [anti_alias_interpolate(x, s) for s in self.scales]

    def forward(self, generated, source, driving, kp_source, kp_driving,
                inpainting_network, kp_extractor, bg_predictor, transform_params,
                bg_param=None, rng=None, **kwargs):
        if rng is None:
            rng = jax.random.PRNGKey(0)
        out_dict = {}
        lw = self.loss_weights

        rec_loss = jnp.float32(0.0)
        if lw['reconstruction'] != 0:
            rec_loss = l1_mean(generated['prediction'], driving) * lw['reconstruction']
        out_dict['reconstruction_loss'] = rec_loss

        # TODO(synk): perceptual term requires pretrained VGG16 LPIPS; since it is
        # unavailable the loss is 0 and the dead pyramid+tanh passes feeding it are
        # skipped (re-enable self.pyramid(...) + tanh once LPIPS exists).
        p_loss = jnp.float32(0.0)
        out_dict['perceptual_loss'] = p_loss

        eq_out = equivariance_forward(driving, kp_driving, kp_extractor,
                                      transform_params, rng)
        eq_loss = eq_out.pop('loss') * lw['equivariance']
        out_dict['equivariance_loss'] = eq_loss
        out_dict.update(eq_out)

        warp_loss = jnp.float32(0.0)
        if lw['warp'] != 0:
            occlusion_map = generated['occlusion_map']
            encode_map = inpainting_network.get_encode(driving, occlusion_map)
            decode_map = generated['warped_encoder_maps']
            # NOTE: per-map L1 sums stay separate tiled Pallas reductions because
            # the encoder levels have different shapes (concat would add a full
            # HBM copy pass without reducing bytes read).
            for i in range(len(encode_map)):
                warp_loss = warp_loss + l1_mean(encode_map[i], decode_map[-i - 1])
            warp_loss = warp_loss * lw['warp']
        out_dict['warp_loss'] = warp_loss

        bg_loss = jnp.float32(0.0)
        if lw['bg'] != 0 and bg_param is not None:
            bg_param_reverse = bg_predictor(driving, source)
            bg_loss = bg_equivariance_loss(bg_param, bg_param_reverse) * lw['bg']
        out_dict['bg_loss'] = bg_loss

        kp_dist_loss = jnp.float32(0.0)
        if 'kp_distance' in lw and lw['kp_distance'] != 0:
            num_kp = kp_source['fg_kp'].shape[1]
            kp_dist_loss = lw['kp_distance'] * (
                _kp_distance(kp_source['fg_kp'], num_kp)
                + _kp_distance(kp_driving['fg_kp'], num_kp))
        out_dict['kp_distance_loss'] = kp_dist_loss

        depth_loss = jnp.float32(0.0)
        if 'depth_constraint' in lw and lw['depth_constraint'] != 0:
            depth_generated = kp_extractor(generated['prediction'])['depth']
            depth_driving = kp_driving['depth']
            depth_loss = lw['depth_constraint'] * l1_mean(depth_generated, depth_driving)
        out_dict['depth_constraint_loss'] = depth_loss

        struct_loss = jnp.float32(0.0)   # self.extractor is None (use_vit_loss=False)
        out_dict['structure_loss'] = struct_loss

        loss = (rec_loss + p_loss + eq_loss + warp_loss + bg_loss
                + kp_dist_loss + depth_loss + struct_loss)
        return loss, out_dict


# ----------------------------------------------------------------------------
# Deterministic stand-ins for the external networks passed to forward()
# (not part of ETPSLoss; plain JAX)
# ----------------------------------------------------------------------------
def make_kp_extractor(key, channels, num_kp):
    k1, k2 = jax.random.split(key)
    w_kp = 0.5 * jax.random.normal(k1, (channels, num_kp * 2), jnp.float32)
    w_d = 0.5 * jax.random.normal(k2, (channels, num_kp), jnp.float32)

    def kp_extractor(frame):
        b = frame.shape[0]
        feats = frame.astype(jnp.float32).mean(axis=(2, 3))          # (B, C)
        fg_kp = jnp.tanh(feats @ w_kp).reshape(b, num_kp, 2)
        depth = jax.nn.sigmoid(feats @ w_d).reshape(b, num_kp, 1)
        return {'fg_kp': fg_kp, 'depth': depth}

    return kp_extractor


def make_bg_predictor(key, channels):
    w = 0.05 * jax.random.normal(key, (2 * channels, 9), jnp.float32)

    def bg_predictor(a, b):
        feats = jnp.concatenate(
            [a.astype(jnp.float32).mean(axis=(2, 3)),
             b.astype(jnp.float32).mean(axis=(2, 3))], axis=-1)
        bsz = a.shape[0]
        return jnp.eye(3, dtype=jnp.float32)[None] + (feats @ w).reshape(bsz, 3, 3)

    return bg_predictor


class InpaintingStandIn:
    # two encoder levels (full-res and 2x anti-alias downsampled via the Pallas
    # blur kernel), each gated by the matching occlusion map.
    def get_encode(self, x, occlusion_map):
        f0 = x * occlusion_map[0]
        f1 = anti_alias_interpolate(x, 0.5) * occlusion_map[1]
        return [f0, f1]


# ----------------------------------------------------------------------------
if __name__ == "__main__":
    key = jax.random.PRNGKey(0)
    B, C, H, W = 2, 3, 16, 16
    num_kp = 10
    keys = jax.random.split(key, 10)

    driving = jax.random.uniform(keys[0], (B, C, H, W), jnp.float32)
    source = jax.random.uniform(keys[1], (B, C, H, W), jnp.float32)
    prediction = jax.random.uniform(keys[2], (B, C, H, W), jnp.float32)
    occ0 = jax.nn.sigmoid(jax.random.normal(keys[3], (B, 1, H, W), jnp.float32))
    occ1 = jax.nn.sigmoid(jax.random.normal(keys[4], (B, 1, H // 2, W // 2), jnp.float32))
    dec0 = 0.1 * jax.random.normal(keys[5], (B, C, H // 2, W // 2), jnp.float32)
    dec1 = 0.1 * jax.random.normal(keys[6], (B, C, H, W), jnp.float32)

    generated = {'prediction': prediction,
                 'occlusion_map': [occ0, occ1],
                 'warped_encoder_maps': [dec0, dec1]}

    kp_extractor = make_kp_extractor(keys[7], C, num_kp)
    bg_predictor = make_bg_predictor(keys[8], C)
    inpainting_network = InpaintingStandIn()

    kp_source = kp_extractor(source)
    kp_driving = kp_extractor(driving)
    bg_param = bg_predictor(source, driving)

    loss_weights = {'reconstruction': 10.0, 'perceptual': 10.0, 'equivariance': 10.0,
                    'warp': 10.0, 'bg': 10.0, 'kp_distance': 10.0,
                    'depth_constraint': 10.0}
    transform_params = {'sigma_affine': 0.05, 'sigma_tps': 0.005, 'points_tps': 5}

    criterion = ETPSLossPallas(channels=C, scales=(1, 0.5), loss_weights=loss_weights)
    loss, out_dict = criterion.forward(
        generated, source, driving, kp_source, kp_driving,
        inpainting_network, kp_extractor, bg_predictor, transform_params,
        bg_param=bg_param, rng=keys[9])

    loss = jax.block_until_ready(loss)
    jax.block_until_ready(out_dict['transformed_frame'])
    jax.block_until_ready(out_dict['equivariance_loss'])
    jax.block_until_ready(out_dict['warp_loss'])
    jax.block_until_ready(out_dict['bg_loss'])
    print("KERNEL_OK")
</pallas_src>

<mosaic_0001>
module attributes {stable_mosaic.version = 11 : i64} {
  func.func @kernel(%arg0: i32, %arg1: memref<12x128xf32, #tpu.memory_space<vmem>>, %arg2: memref<12x128xf32, #tpu.memory_space<vmem>>, %arg3: memref<1x1xf32, #tpu.memory_space<vmem>>) attributes {dimension_semantics = [#tpu.dimension_semantics<arbitrary>], iteration_bounds = array<i64: 1>, scalar_prefetch = 0 : i64, scratch_operands = 0 : i64, tpu.core_type = #tpu.core_type<tc>, window_params = [{transform_indices = @transform_0, window_bounds = array<i64: 12, 128>}, {transform_indices = @transform_1, window_bounds = array<i64: 12, 128>}, {pipeline_mode = #tpu.pipeline_mode<synchronous>, transform_indices = @transform_2, window_bounds = array<i64: 1, 1>}]} {
    %c0_i32 = arith.constant 0 : i32
    %0 = arith.cmpi eq, %arg0, %c0_i32 : i32
    %1 = arith.extui %0 : i1 to i32
    %c0_i32_0 = arith.constant 0 : i32
    %2 = arith.cmpi ne, %1, %c0_i32_0 : i32
    scf.if %2 {
      %cst_8 = arith.constant 0.000000e+00 : f32
      %15 = vector.broadcast %cst_8 : f32 to vector<1x1xf32>
      %c0_9 = arith.constant 0 : index
      %c0_10 = arith.constant 0 : index
      %16 = vector.load %arg3[%c0_9, %c0_10] : memref<1x1xf32, #tpu.memory_space<vmem>>, vector<1x1xf32>
      tpu.vector_store %arg3[%c0_9, %c0_10], %15 {strides = array<i32>} : memref<1x1xf32, #tpu.memory_space<vmem>>, vector<1x1xf32>,
    } else {
    }
    %c0 = arith.constant 0 : index
    %c0_1 = arith.constant 0 : index
    %3 = vector.load %arg1[%c0, %c0_1] : memref<12x128xf32, #tpu.memory_space<vmem>>, vector<12x128xf32>
    %c0_2 = arith.constant 0 : index
    %c0_3 = arith.constant 0 : index
    %4 = vector.load %arg2[%c0_2, %c0_3] : memref<12x128xf32, #tpu.memory_space<vmem>>, vector<12x128xf32>
    %5 = arith.subf %3, %4 : vector<12x128xf32>
    %6 = math.absf %5 : vector<12x128xf32>
    %c0_4 = arith.constant 0 : index
    %c0_5 = arith.constant 0 : index
    %7 = vector.load %arg3[%c0_4, %c0_5] : memref<1x1xf32, #tpu.memory_space<vmem>>, vector<1x1xf32>
    %8 = vector.shape_cast %6 : vector<12x128xf32> to vector<1x12x128xf32>
    %cst = arith.constant dense<0.000000e+00> : vector<1xf32>
    %9 = vector.multi_reduction <add>, %8, %cst [1, 2] : vector<1x12x128xf32> to vector<1xf32>
    %10 = vector.shape_cast %9 : vector<1xf32> to vector<1x1x1xf32>
    %11 = vector.extract %10[0, 0, 0] : f32 from vector<1x1x1xf32>
    %12 = vector.broadcast %11 : f32 to vector<1x1xf32>
    %13 = arith.addf %7, %12 : vector<1x1xf32>
    %c0_6 = arith.constant 0 : index
    %c0_7 = arith.constant 0 : index
    %14 = vector.load %arg3[%c0_6, %c0_7] : memref<1x1xf32, #tpu.memory_space<vmem>>, vector<1x1xf32>
    tpu.vector_store %arg3[%c0_6, %c0_7], %13 {strides = array<i32>} : memref<1x1xf32, #tpu.memory_space<vmem>>, vector<1x1xf32>,
    return
  }
  func.func @transform_0(%arg0: i32) -> (i32, i32) {
    %c0_i32 = arith.constant 0 : i32
    %c0_i32_0 = arith.constant 0 : i32
    return %arg0, %c0_i32 : i32, i32
  }
  func.func @transform_1(%arg0: i32) -> (i32, i32) {
    %c0_i32 = arith.constant 0 : i32
    %c0_i32_0 = arith.constant 0 : i32
    return %arg0, %c0_i32 : i32, i32
  }
  func.func @transform_2(%arg0: i32) -> (i32, i32) {
    %c0_i32 = arith.constant 0 : i32
    %c0_i32_0 = arith.constant 0 : i32
    %c0_i32_1 = arith.constant 0 : i32
    return %c0_i32, %c0_i32_0 : i32, i32
  }
}

</mosaic_0001>

<bundles_post_ra>
// kernel: tpu_custom_call.1
= control target key start
LH: loop header
LB: loop body
LE: loop exit
PB: predicated region body
PF: predicated region fallthrough
CT: control target
= control target key end

     0   :  { %7 = vsyncpa [#allocation3], 0  ;;  %s193_s0 = inlined_call_operand.hbm [shape: f32[12,128], index: 0, kind: input, shape index: {}]   ;;  %s194_s1 = inlined_call_operand.hbm [shape: f32[12,128], index: 1, kind: input, shape index: {}]   ;;  %s195_s2 = inlined_call_operand.hbm [shape: f32[1,1], index: 2, kind: output, shape index: {}]  }
   0x1   :  { %8 = vsyncpa [#allocation6], 0 }
   0x2   :  { %9 = vsyncpa [#allocation4], 0  ;;  %s161_s9 = smov [#allocation2]  }
   0x3   :  { %s15_s10 = sshll.u32 %s161_s9, 4  ;;  %s16_s10 = int_to_ptr.vmem [resolvable:$true] %s15_s10 }
   0x4   :  { %s103_s11 = scalar_lea.vmem %s16_s10, 256  ;;  %p108_p1 = scmp.lt.s32.totalorder %s16_s10, %s16_s10 }
   0x5   :  { %p104_p0 = scmp.ne.s32.totalorder %s16_s10, %s103_s11  ;;  %p109_p2 = scmp.lt.s32.totalorder %s103_s11, %s103_s11 }
   0x7   :  { %p110_p3 = por %p109_p2, %p108_p1 }
   0x9   :  { %p111_p4 = pnand %p110_p3, %p104_p0 }
   0xb   :  { %114 = shalt.err (!%p111_p4)
}
   0xc   :  { %s162_s12 = smov 128   ;;  %s163_s13 = smov 8  }
   0xd   :  { %21 = dma.hbm_to_vmem [thread:$0]  %s193_s0, 256, %s16_s10, [#allocation3], %s162_s12, %s162_s12, %s163_s13  }
   0xe   :  { %s164_s16 = smov [#allocation5]  }
   0xf   :  { %s27_s17 = sshll.u32 %s164_s16, 4  ;;  %s28_s17 = int_to_ptr.vmem [resolvable:$true] %s27_s17 }
  0x10   :  { %s123_s18 = scalar_lea.vmem %s28_s17, 256  ;;  %p128_p6 = scmp.lt.s32.totalorder %s28_s17, %s28_s17 }
  0x11   :  { %p124_p5 = scmp.ne.s32.totalorder %s28_s17, %s123_s18  ;;  %p129_p7 = scmp.lt.s32.totalorder %s123_s18, %s123_s18 }
  0x13   :  { %p130_p8 = por %p129_p7, %p128_p6 }
  0x15   :  { %p131_p9 = pnand %p130_p8, %p124_p5 }
  0x17   :  { %134 = shalt.err (!%p131_p9)
}
  0x18   :  { %33 = dma.hbm_to_vmem [thread:$0]  %s194_s1, 256, %s28_s17, [#allocation6], %s162_s12, %s162_s12, %s163_s13  }
  0x19   :  { %155 = dma.done.wait [#allocation3], 256  }
  0x1a   :  { %156 = vsyncadd [#allocation3], 4294967040 }
  0x1b   :  { %157 = dma.done.wait [#allocation6], 256  }
  0x1c   :  { %158 = vsyncadd [#allocation6], 4294967040  ;;  %vm44_vm0 = vcmask 0   ;;  %v165_v0 = vmov 0.0   ;;  %v46_v1 = vld [vmem:[#allocation2] sm:$0xff]  ;;  %v48_v3 = vld [vmem:[#allocation5] sm:$0xff] }
  0x1d   :  { %45 = vst.msk [vmem:[#allocation7] sm:$0x1] %vm44_vm0, %v165_v0  ;;  %v47_v2 = vld [vmem:[#allocation2 + $0x8] sm:$0xf]  ;;  %v49_v4 = vld [vmem:[#allocation5 + $0x8] sm:$0xf]  ;;  %v50_v5 = vsub.f32 %v46_v1, %v48_v3 }
  0x1e   :  { %v51_v6 = vsub.f32 %v47_v2, %v49_v4  ;;  %vm55_vm1 = vcmask 1043456   ;;  %s166_s0 = smov [#allocation7]  }
  0x1f   :  { %v52_v7 = vand.u32 2147483647, %v50_v5  ;;  %s77_s1 = sshll.u32 %s166_s0, 4  ;;  %s78_s1 = int_to_ptr.vmem [resolvable:$true] %s77_s1 }
  0x20   :  { %v53_v8 = vand.u32 2147483647, %v51_v6  ;;  %s135_s22 = scalar_lea.vmem %s78_s1, 16  ;;  %s139_s23 = scalar_lea.vmem %s78_s1, 32 }
  0x21   :  { %p136_p10 = scmp.ne.s32.totalorder %s78_s1, %s135_s22  ;;  %p140_p11 = scmp.lt.s32.totalorder %s78_s1, %s78_s1 }
  0x22   :  { %v56_v9 = vsel %vm55_vm1, %v53_v8, 0.0  ;;  %p141_p12 = scmp.lt.s32.totalorder %s139_s23, %s135_s22 }
  0x23   :  { %v57_v10 = vadd.f32 %v56_v9, %v52_v7 }
  0x24   :  { %v54_v18 = vld [vmem:[#allocation7] sm:$0x1]  ;;  %p142_p13 = por %p141_p12, %p140_p11 }
  0x25   :  { %58 = vadd.xlane.f32.xlu0 %v57_v10 }
  0x26   :  { %p143_p0 = pnand %p142_p13, %p136_p10 }
  0xae   :  { %v59_v11 = vpop.xlane.xlu0 %58 }
  0xaf   :  { %v60_v12 = vrot.slane %v59_v11, 4 }
  0xb1   :  { %v61_v13 = vadd.f32 %v60_v12, %v59_v11 }
  0xb3   :  { %v62_v14 = vrot.slane %v61_v13, 2 }
  0xb5   :  { %v63_v15 = vadd.f32 %v62_v14, %v61_v13 }
  0xb7   :  { %v64_v16 = vrot.slane %v63_v15, 1 }
  0xb9   :  { %v65_v17 = vadd.f32 %v64_v16, %v63_v15 }
  0xbb   :  { %87 = vpush %v65_v17 }
  0xec   :  { %s88_s21 = spop %87 }
  0xed   :  { %v67_v19 = vstv %s88_s21 }
  0xee   :  { %v68_v20 = vadd.f32 %v67_v19, %v54_v18 }
  0xf0   :  { %70 = vst.msk [vmem:[#allocation7] sm:$0x1] %vm44_vm0, %v68_v20 }
  0xf1   :  { %146 = shalt.err (!%p143_p0)
}
  0xf2   :  { %80 = dma.vmem_to_hbm [thread:$0]  %s78_s1, 16, %s195_s2, [#allocation4]  }
  0xf3   :  { %159 = dma.done.wait [#allocation4], 16  }
  0xf4   :  { %160 = vsyncadd [#allocation4], 4294967280 }
  0xf5   :  { %84 = vsyncpa [#allocation3], 1 }
  0xf6   :  { %85 = vsyncpa [#allocation6], 1 }
  0xf7   :  { %86 = vsyncpa [#allocation4], 1 }

</bundles_post_ra>
